<compile_context>
chip_gen: v6e
topology: v6e:2x2x1
jax: 0.10.0
libtpu: 0.0.40
codegen_flags: <defaults>
</compile_context>

<pallas_src>
import jax
import jax.numpy as jnp
from jax.experimental import pallas as pl
from jax.experimental.pallas import tpu as pltpu

LANES = 128
SUBLANES = 8


def _round_up(n, m):
    return ((n + m - 1) // m) * m


def actor_kernel(bound_ref, x_ref, w1_ref, b1_ref, w2_ref, b2_ref, o_ref):
    # Layer 1: (TM, F) @ (F, Hp) on the MXU with f32 accumulate; bias + ReLU on the VPU.
    x = x_ref[...]
    h = jnp.dot(x.astype(w1_ref.dtype), w1_ref[...],
                preferred_element_type=jnp.float32)
    h = jnp.maximum(h + b1_ref[...], 0.0)
    # Layer 2: (TM, Hp) @ (Hp, Op) stays lane-dense/padded for the MXU.
    y = jnp.dot(h.astype(w2_ref.dtype), w2_ref[...],
                preferred_element_type=jnp.float32)
    y = y + b2_ref[...]
    # Narrow store: tanh/scale only the live output columns, write only those
    # back to HBM (the padded columns never leave VMEM).
    n_out = o_ref.shape[1]
    o_ref[...] = (jnp.tanh(y[:, :n_out]) * bound_ref[0, 0]).astype(o_ref.dtype)


def pad_params(w1, b1, w2, b2, *, weight_dtype=jnp.float32):
    """Zero-pad hidden/output dims to 128 lanes once, outside the kernel.

    Exactness: padded hidden units have zero weight & bias (ReLU(0)=0) and zero
    rows in w2, so they contribute nothing; padded output columns are never
    stored (narrow store in-kernel).
    """
    n_features, n_hidden = w1.shape
    n_outputs = w2.shape[1]
    hp = _round_up(n_hidden, LANES)
    op = _round_up(n_outputs, LANES)
    w1p = jnp.zeros((n_features, hp), weight_dtype).at[:, :n_hidden].set(w1.astype(weight_dtype))
    b1p = jnp.zeros((1, hp), jnp.float32).at[:, :n_hidden].set(
        b1.reshape(1, n_hidden).astype(jnp.float32))
    w2p = jnp.zeros((hp, op), weight_dtype).at[:n_hidden, :n_outputs].set(w2.astype(weight_dtype))
    b2p = jnp.zeros((1, op), jnp.float32).at[:, :n_outputs].set(
        b2.reshape(1, n_outputs).astype(jnp.float32))
    return w1p, b1p, w2p, b2p


def _select_batch_tile(b, max_tm=1024):
    """Per-generation batch tile.

    v5e/v6e (single TensorCore): one grid step whenever the batch fits in a
    tile (the grid is a serial loop; each step costs ~0.35 us of overhead).
    v7x (two TensorCores): an even number of equal tiles so the "parallel"
    grid axis shards both cores without load imbalance.
    Tiles are capped at max_tm rows (multiples of 8 sublanes); VMEM per tile at
    tm=1024 is <4 MiB, far under the 32 MiB scoped limit on every generation.
    """
    b8 = _round_up(b, SUBLANES)
    kind = ""
    try:
        kind = jax.devices()[0].device_kind.lower()
    except Exception:
        pass
    dual_tc = "v7" in kind
    if dual_tc and b8 >= 2 * SUBLANES:
        ntiles = 2
        while -(-b8 // ntiles) > max_tm:
            ntiles += 2
        tm = _round_up(-(-b8 // ntiles), SUBLANES)
    else:
        tm = min(b8, max_tm)
    b_pad = _round_up(b8, tm)
    return tm, b_pad


def actor_forward(x, w1p, b1p, w2p, b2p, bound, n_outputs, *, max_block_rows=1024):
    """x: (B, n_features) f32. Returns (B, n_outputs) f32."""
    b, f = x.shape
    hp = w1p.shape[1]
    op = w2p.shape[1]

    tm, b_pad = _select_batch_tile(b, max_block_rows)
    if b_pad != b:
        x = jnp.pad(x, ((0, b_pad - b), (0, 0)))
    grid = (b_pad // tm,)

    bound_arr = jnp.full((1, 1), bound, dtype=jnp.float32)

    out = pl.pallas_call(
        actor_kernel,
        out_shape=jax.ShapeDtypeStruct((b_pad, n_outputs), jnp.float32),
        grid=grid,
        in_specs=[
            pl.BlockSpec(memory_space=pltpu.MemorySpace.SMEM),  # bound (1,1) scalar
            pl.BlockSpec((tm, f), lambda i: (i, 0)),            # x: streamed per tile
            pl.BlockSpec((f, hp), lambda i: (0, 0)),            # w1: VMEM-resident
            pl.BlockSpec((1, hp), lambda i: (0, 0)),            # b1: VMEM-resident
            pl.BlockSpec((hp, op), lambda i: (0, 0)),           # w2: VMEM-resident
            pl.BlockSpec((1, op), lambda i: (0, 0)),            # b2: VMEM-resident
        ],
        out_specs=pl.BlockSpec((tm, n_outputs), lambda i: (i, 0)),  # narrow output
        compiler_params=pltpu.CompilerParams(
            dimension_semantics=("parallel",),                  # v7x: tiles across 2 TCs
            vmem_limit_bytes=32 * 1024 * 1024,
        ),
    )(bound_arr, x, w1p, b1p, w2p, b2p)
    return out[:b]


def init_params(key, n_features, n_hidden, n_outputs):
    """PyTorch-default-style init: U(-1/sqrt(fan_in), 1/sqrt(fan_in))."""
    k1, k2, k3, k4 = jax.random.split(key, 4)
    lim1 = 1.0 / (n_features ** 0.5)
    lim2 = 1.0 / (n_hidden ** 0.5)
    w1 = jax.random.uniform(k1, (n_features, n_hidden), jnp.float32, -lim1, lim1)
    b1 = jax.random.uniform(k2, (n_hidden,), jnp.float32, -lim1, lim1)
    w2 = jax.random.uniform(k3, (n_hidden, n_outputs), jnp.float32, -lim2, lim2)
    b2 = jax.random.uniform(k4, (n_outputs,), jnp.float32, -lim2, lim2)
    return w1, b1, w2, b2


if __name__ == "__main__":
    # Pendulum-style DDPG actor: state dim 3, hidden 30, action dim 1, bound 2.
    batch, n_features, n_hidden, n_outputs = 64, 3, 30, 1
    bound = 2.0

    key = jax.random.PRNGKey(0)
    kx, kp = jax.random.split(key)
    x = jax.random.normal(kx, (batch, n_features), jnp.float32)
    w1, b1, w2, b2 = init_params(kp, n_features, n_hidden, n_outputs)

    # Pure-JAX reference (same math, outside Pallas).
    ref = jnp.tanh(jnp.maximum(x @ w1 + b1, 0.0) @ w2 + b2) * bound

    # f32 weights: should match the reference tightly.
    params_f32 = pad_params(w1, b1, w2, b2, weight_dtype=jnp.float32)
    out = jax.block_until_ready(actor_forward(x, *params_f32, bound, n_outputs))
    assert out.shape == (batch, n_outputs)
    assert jnp.allclose(out, ref, atol=1e-5, rtol=1e-5)

    # bf16 weights (v6e/v7x MXU-friendly); elementwise math stays f32.
    # Note: on v5e (no bf16 VPU) keep f32 weights — casts are pure overhead there.
    params_bf16 = pad_params(w1, b1, w2, b2, weight_dtype=jnp.bfloat16)
    out_bf16 = jax.block_until_ready(actor_forward(x, *params_bf16, bound, n_outputs))
    assert out_bf16.shape == (batch, n_outputs)
    assert jnp.allclose(out_bf16, ref, atol=1e-1)

    print("KERNEL_OK")
</pallas_src>

<mosaic_0001>
module attributes {stable_mosaic.version = 11 : i64} {
  func.func @actor_kernel(%arg0: i32, %arg1: memref<1x1xf32, #tpu.memory_space<smem>>, %arg2: memref<64x3xf32, #tpu.memory_space<vmem>>, %arg3: memref<3x128xf32, #tpu.memory_space<vmem>>, %arg4: memref<1x128xf32, #tpu.memory_space<vmem>>, %arg5: memref<128x128xf32, #tpu.memory_space<vmem>>, %arg6: memref<1x128xf32, #tpu.memory_space<vmem>>, %arg7: memref<64x1xf32, #tpu.memory_space<vmem>>) attributes {dimension_semantics = [#tpu.dimension_semantics<parallel>], iteration_bounds = array<i64: 1>, scalar_prefetch = 0 : i64, scratch_operands = 0 : i64, tpu.core_type = #tpu.core_type<tc>, window_params = [{transform_indices = @transform_0, window_bounds = array<i64: 1, 1>}, {transform_indices = @transform_1, window_bounds = array<i64: 64, 3>}, {pipeline_mode = #tpu.pipeline_mode<synchronous>, transform_indices = @transform_2, window_bounds = array<i64: 3, 128>}, {pipeline_mode = #tpu.pipeline_mode<synchronous>, transform_indices = @transform_3, window_bounds = array<i64: 1, 128>}, {pipeline_mode = #tpu.pipeline_mode<synchronous>, transform_indices = @transform_4, window_bounds = array<i64: 128, 128>}, {pipeline_mode = #tpu.pipeline_mode<synchronous>, transform_indices = @transform_5, window_bounds = array<i64: 1, 128>}, {transform_indices = @transform_6, window_bounds = array<i64: 64, 1>}]} {
    %c0 = arith.constant 0 : index
    %c0_0 = arith.constant 0 : index
    %0 = vector.load %arg2[%c0, %c0_0] : memref<64x3xf32, #tpu.memory_space<vmem>>, vector<64x3xf32>
    %c0_1 = arith.constant 0 : index
    %c0_2 = arith.constant 0 : index
    %1 = vector.load %arg3[%c0_1, %c0_2] : memref<3x128xf32, #tpu.memory_space<vmem>>, vector<3x128xf32>
    %cst = arith.constant dense<0.000000e+00> : vector<64x128xf32>
    %2 = tpu.matmul %0, %1, %cst {dimension_numbers = #tpu.dot_dimension_numbers<[1], [0], [0], [1], [0, 0, 1, 1], [], []>} : vector<64x3xf32>, vector<3x128xf32>, vector<64x128xf32> -> vector<64x128xf32>
    %c0_3 = arith.constant 0 : index
    %c0_4 = arith.constant 0 : index
    %3 = vector.load %arg4[%c0_3, %c0_4] : memref<1x128xf32, #tpu.memory_space<vmem>>, vector<1x128xf32>
    %4 = vector.broadcast %3 : vector<1x128xf32> to vector<64x128xf32>
    %5 = arith.addf %2, %4 : vector<64x128xf32>
    %cst_5 = arith.constant 0.000000e+00 : f32
    %6 = vector.broadcast %cst_5 : f32 to vector<64x128xf32>
    %7 = arith.maximumf %5, %6 : vector<64x128xf32>
    %c0_6 = arith.constant 0 : index
    %c0_7 = arith.constant 0 : index
    %8 = vector.load %arg5[%c0_6, %c0_7] : memref<128x128xf32, #tpu.memory_space<vmem>>, vector<128x128xf32>
    %cst_8 = arith.constant dense<0.000000e+00> : vector<64x128xf32>
    %9 = tpu.matmul %7, %8, %cst_8 {dimension_numbers = #tpu.dot_dimension_numbers<[1], [0], [0], [1], [0, 0, 1, 1], [], []>} : vector<64x128xf32>, vector<128x128xf32>, vector<64x128xf32> -> vector<64x128xf32>
    %c0_9 = arith.constant 0 : index
    %c0_10 = arith.constant 0 : index
    %10 = vector.load %arg6[%c0_9, %c0_10] : memref<1x128xf32, #tpu.memory_space<vmem>>, vector<1x128xf32>
    %11 = vector.broadcast %10 : vector<1x128xf32> to vector<64x128xf32>
    %12 = arith.addf %9, %11 : vector<64x128xf32>
    %13 = vector.extract_strided_slice %12 {offsets = [0, 0], sizes = [64, 1], strides = [1, 1]} : vector<64x128xf32> to vector<64x1xf32>
    %14 = math.tanh %13 : vector<64x1xf32>
    %c0_11 = arith.constant 0 : index
    %c0_12 = arith.constant 0 : index
    %15 = memref.load %arg1[%c0_11, %c0_12] : memref<1x1xf32, #tpu.memory_space<smem>>
    %16 = vector.broadcast %15 : f32 to vector<64x1xf32>
    %17 = arith.mulf %14, %16 : vector<64x1xf32>
    %c0_13 = arith.constant 0 : index
    %c0_14 = arith.constant 0 : index
    %18 = vector.load %arg7[%c0_13, %c0_14] : memref<64x1xf32, #tpu.memory_space<vmem>>, vector<64x1xf32>
    tpu.vector_store %arg7[%c0_13, %c0_14], %17 {strides = array<i32>} : memref<64x1xf32, #tpu.memory_space<vmem>>, vector<64x1xf32>,
    return
  }
  func.func @transform_0(%arg0: i32) -> (i32, i32) {
    %c0_i32 = arith.constant 0 : i32
    %c0_i32_0 = arith.constant 0 : i32
    %c0_i32_1 = arith.constant 0 : i32
    return %c0_i32, %c0_i32_0 : i32, i32
  }
  func.func @transform_1(%arg0: i32) -> (i32, i32) {
    %c0_i32 = arith.constant 0 : i32
    %c0_i32_0 = arith.constant 0 : i32
    return %arg0, %c0_i32 : i32, i32
  }
  func.func @transform_2(%arg0: i32) -> (i32, i32) {
    %c0_i32 = arith.constant 0 : i32
    %c0_i32_0 = arith.constant 0 : i32
    %c0_i32_1 = arith.constant 0 : i32
    return %c0_i32, %c0_i32_0 : i32, i32
  }
  func.func @transform_3(%arg0: i32) -> (i32, i32) {
    %c0_i32 = arith.constant 0 : i32
    %c0_i32_0 = arith.constant 0 : i32
    %c0_i32_1 = arith.constant 0 : i32
    return %c0_i32, %c0_i32_0 : i32, i32
  }
  func.func @transform_4(%arg0: i32) -> (i32, i32) {
    %c0_i32 = arith.constant 0 : i32
    %c0_i32_0 = arith.constant 0 : i32
    %c0_i32_1 = arith.constant 0 : i32
    return %c0_i32, %c0_i32_0 : i32, i32
  }
  func.func @transform_5(%arg0: i32) -> (i32, i32) {
    %c0_i32 = arith.constant 0 : i32
    %c0_i32_0 = arith.constant 0 : i32
    %c0_i32_1 = arith.constant 0 : i32
    return %c0_i32, %c0_i32_0 : i32, i32
  }
  func.func @transform_6(%arg0: i32) -> (i32, i32) {
    %c0_i32 = arith.constant 0 : i32
    %c0_i32_0 = arith.constant 0 : i32
    return %arg0, %c0_i32 : i32, i32
  }
}

</mosaic_0001>

<bundles_post_ra>
// kernel: tpu_custom_call.1
= control target key start
LH: loop header
LB: loop body
LE: loop exit
PB: predicated region body
PF: predicated region fallthrough
CT: control target
= control target key end

     0   :  { %12 = vsyncpa [#allocation4], 0  ;;  %s531_s21 = smov [#allocation3]   ;;  %s648_s0 = inlined_call_operand.<no memory space> [shape: f32[1,1], index: 0, kind: input, shape index: {}]   ;;  %s649_s1 = inlined_call_operand.vmem [shape: f32[64,3], index: 1, kind: input, shape index: {}]   ;;  %s650_s2 = inlined_call_operand.vmem [shape: f32[3,128], index: 2, kind: input, shape index: {}]   ;;  %s651_s3 = inlined_call_operand.vmem [shape: f32[1,128], index: 3, kind: input, shape index: {}]   ;;  %s652_s4 = inlined_call_operand.hbm [shape: f32[128,128], index: 4, kind: input, shape index: {}]   ;;  %s653_s5 = inlined_call_operand.vmem [shape: f32[1,128], index: 5, kind: input, shape index: {}]   ;;  %s654_s6 = inlined_call_operand.vmem [shape: f32[64,1], index: 6, kind: output, shape index: {}]  }
   0x1   :  { %s26_s22 = sshll.u32 %s531_s21, 4  ;;  %s27_s22 = int_to_ptr.vmem [resolvable:$true] %s26_s22 }
   0x2   :  { %s517_s23 = scalar_lea.vmem %s27_s22, 2048  ;;  %p522_p1 = scmp.lt.s32.totalorder %s27_s22, %s27_s22 }
   0x3   :  { %p518_p0 = scmp.ne.s32.totalorder %s27_s22, %s517_s23  ;;  %p523_p2 = scmp.lt.s32.totalorder %s517_s23, %s517_s23 }
   0x5   :  { %p524_p3 = por %p523_p2, %p522_p1 }
   0x7   :  { %p525_p4 = pnand %p524_p3, %p518_p0 }
   0x9   :  { %528 = shalt.err (!%p525_p4)
}
   0xa   :  { %s532_s24 = smov 128   ;;  %s533_s25 = smov 8  }
   0xb   :  { %32 = dma.hbm_to_vmem [thread:$0]  %s652_s4, 2048, %s27_s22, [#allocation4], %s532_s24, %s532_s24, %s533_s25  }
   0xc   :  { %529 = dma.done.wait [#allocation4], 2048  }
   0xd   :  { %530 = vsyncadd [#allocation4], 4294965248  ;;  %vm79_vm0 = vcmask 1042432   ;;  %vm54_vm1 = vcmask 23552   ;;  %v46_v0 = vld [vmem:[%s650_s2] sm:$0x7] }
   0xe   :  { %v38_v1 = vld [vmem:[%s649_s1] sm:$0xff]  ;;  %v39_v2 = vld [vmem:[%s649_s1 + $0x8] sm:$0xff]  ;;  %400 = vmatprep.subr.msk.mxu0 %vm79_vm0, %v46_v0  ;;  %v40_v3 = vld [vmem:[%s649_s1 + $0x10] sm:$0xff]  ;;  %vm342_vm2 = vcmask 7168  }
   0xf   :  { %402 = vmatprep.mubr.msk.f32.mxu0 %vm54_vm1, %v38_v1  ;;  %401 = vmatpush3.msk.msra.mxu0 %vm79_vm0, %v46_v0  ;;  %v211_v4 = vld [vmem:[#allocation3 + $0x78] sm:$0xff]  ;;  %v210_v5 = vld [vmem:[#allocation3 + $0x70] sm:$0xff]  ;;  %v42_v7 = vld [vmem:[%s649_s1 + $0x20] sm:$0xff]  ;;  %v333_v1 = vstv %s648_s0 }
  0x10   :  { %403 = vmatmul.mubr.msk.f32.vlgmr.msra.gmra.mxu0 %vm54_vm1, %v39_v2  ;;  %v41_v6 = vld [vmem:[%s649_s1 + $0x18] sm:$0xff]  ;;  %414 = vmatprep.subr.mxu0 %v211_v4  ;;  %v209_v8 = vld [vmem:[#allocation3 + $0x68] sm:$0xff]  ;;  %v208_v10 = vld [vmem:[#allocation3 + $0x60] sm:$0xff] }
  0x11   :  { %405 = vmatprep.mubr.msk.f32.mxu0 %vm54_vm1, %v40_v3  ;;  %415 = vmatpush3.msra.mxu0 %v211_v4  ;;  %v43_v9 = vld [vmem:[%s649_s1 + $0x28] sm:$0xff]  ;;  %v44_v11 = vld [vmem:[%s649_s1 + $0x30] sm:$0xff]  ;;  %v207_v12 = vld [vmem:[#allocation3 + $0x58] sm:$0xff] }
  0x12   :  { %458 = vmatprep.subr.mxu1 %v211_v4  ;;  %416 = vmatprep.subr.mxu0 %v210_v5  ;;  %v45_v13 = vld [vmem:[%s649_s1 + $0x38] sm:$0xff]  ;;  %v206_v14 = vld [vmem:[#allocation3 + $0x50] sm:$0xff]  ;;  %v205_v15 = vld [vmem:[#allocation3 + $0x48] sm:$0xff] }
  0x13   :  { %474 = vmatpush3.msra.mxu1 %v211_v4  ;;  %417 = vmatpush3.msra.mxu0 %v210_v5  ;;  %v204_v16 = vld [vmem:[#allocation3 + $0x40] sm:$0xff]  ;;  %v203_v17 = vld [vmem:[#allocation3 + $0x38] sm:$0xff]  ;;  %v202_v18 = vld [vmem:[#allocation3 + $0x30] sm:$0xff] }
  0x14   :  { %406 = vmatmul.mubr.msk.f32.gmra.mxu0 %vm54_vm1, %v41_v6  ;;  %459 = vmatprep.subr.mxu1 %v210_v5  ;;  %v201_v19 = vld [vmem:[#allocation3 + $0x28] sm:$0xff]  ;;  %v200_v20 = vld [vmem:[#allocation3 + $0x20] sm:$0xff]  ;;  %v199_v21 = vld [vmem:[#allocation3 + $0x18] sm:$0xff] }
  0x15   :  { %408 = vmatprep.mubr.msk.f32.mxu0 %vm54_vm1, %v42_v7  ;;  %418 = vmatprep.subr.mxu0 %v209_v8  ;;  %v198_v22 = vld [vmem:[#allocation3 + $0x10] sm:$0xff]  ;;  %v197_v23 = vld [vmem:[#allocation3 + $0x8] sm:$0xff]  ;;  %v196_v24 = vld [vmem:[#allocation3] sm:$0xff] }
  0x16   :  { %475 = vmatpush3.msra.mxu1 %v210_v5  ;;  %419 = vmatpush3.msra.mxu0 %v209_v8  ;;  %v356_v25 = vld [vmem:[%s651_s3] ss:$0 sm:$0xff] }
  0x17   :  { %460 = vmatprep.subr.mxu1 %v209_v8  ;;  %420 = vmatprep.subr.mxu0 %v208_v10  ;;  %v366_v50 = vld [vmem:[%s653_s5] ss:$0 sm:$0xff] }
  0x18   :  { %409 = vmatmul.mubr.msk.f32.gmra.mxu0 %vm54_vm1, %v43_v9  ;;  %476 = vmatpush3.msra.mxu1 %v209_v8 }
  0x19   :  { %411 = vmatprep.mubr.msk.f32.mxu0 %vm54_vm1, %v44_v11  ;;  %421 = vmatpush3.msra.mxu0 %v208_v10 }
  0x1a   :  { %422 = vmatprep.subr.mxu0 %v207_v12  ;;  %461 = vmatprep.subr.mxu1 %v208_v10 }
  0x1b   :  { %423 = vmatpush3.msra.mxu0 %v207_v12  ;;  %477 = vmatpush3.msra.mxu1 %v208_v10 }
  0x1c   :  { %412 = vmatmul.mubr.msk.f32.gmra.mxu0 %vm54_vm1, %v45_v13  ;;  %424 = vmatprep.subr.mxu0 %v206_v14 }
  0x1d   :  { %425 = vmatpush3.msra.mxu0 %v206_v14  ;;  %462 = vmatprep.subr.mxu1 %v207_v12 }
  0x1e   :  { %426 = vmatprep.subr.mxu0 %v205_v15  ;;  %478 = vmatpush3.msra.mxu1 %v207_v12 }
  0x1f   :  { %427 = vmatpush3.msra.mxu0 %v205_v15  ;;  %463 = vmatprep.subr.mxu1 %v206_v14 }
  0x20   :  { %428 = vmatprep.subr.mxu0 %v204_v16  ;;  %479 = vmatpush3.msra.mxu1 %v206_v14 }
  0x21   :  { %429 = vmatpush3.msra.mxu0 %v204_v16  ;;  %464 = vmatprep.subr.mxu1 %v205_v15 }
  0x22   :  { %430 = vmatprep.subr.mxu0 %v203_v17  ;;  %480 = vmatpush3.msra.mxu1 %v205_v15 }
  0x23   :  { %431 = vmatpush3.msra.mxu0 %v203_v17  ;;  %465 = vmatprep.subr.mxu1 %v204_v16 }
  0x24   :  { %432 = vmatprep.subr.mxu0 %v202_v18  ;;  %481 = vmatpush3.msra.mxu1 %v204_v16 }
  0x25   :  { %433 = vmatpush3.msra.mxu0 %v202_v18  ;;  %466 = vmatprep.subr.mxu1 %v203_v17 }
  0x26   :  { %434 = vmatprep.subr.mxu0 %v201_v19  ;;  %482 = vmatpush3.msra.mxu1 %v203_v17 }
  0x27   :  { %435 = vmatpush3.msra.mxu0 %v201_v19  ;;  %467 = vmatprep.subr.mxu1 %v202_v18 }
  0x28   :  { %436 = vmatprep.subr.mxu0 %v200_v20  ;;  %483 = vmatpush3.msra.mxu1 %v202_v18 }
  0x29   :  { %437 = vmatpush3.msra.mxu0 %v200_v20  ;;  %468 = vmatprep.subr.mxu1 %v201_v19 }
  0x2a   :  { %484 = vmatpush3.msra.mxu1 %v201_v19  ;;  %438 = vmatprep.subr.mxu0 %v199_v21 }
  0x2b   :  { %469 = vmatprep.subr.mxu1 %v200_v20  ;;  %439 = vmatpush3.msra.mxu0 %v199_v21 }
  0x2c   :  { %485 = vmatpush3.msra.mxu1 %v200_v20  ;;  %440 = vmatprep.subr.mxu0 %v198_v22 }
  0x2d   :  { %470 = vmatprep.subr.mxu1 %v199_v21  ;;  %441 = vmatpush3.msra.mxu0 %v198_v22 }
  0x2e   :  { %486 = vmatpush3.msra.mxu1 %v199_v21  ;;  %442 = vmatprep.subr.mxu0 %v197_v23 }
  0x2f   :  { %471 = vmatprep.subr.mxu1 %v198_v22  ;;  %443 = vmatpush3.msra.mxu0 %v197_v23 }
  0x30   :  { %487 = vmatpush3.msra.mxu1 %v198_v22  ;;  %444 = vmatprep.subr.mxu0 %v196_v24 }
  0x31   :  { %472 = vmatprep.subr.mxu1 %v197_v23  ;;  %445 = vmatpush3.msra.mxu0 %v196_v24 }
  0x32   :  { %488 = vmatpush3.msra.mxu1 %v197_v23 }
  0x33   :  { %473 = vmatprep.subr.mxu1 %v196_v24 }
  0x34   :  { %489 = vmatpush3.msra.mxu1 %v196_v24 }
  0xd0   :  { %v404_v26 = vpop.f32.mrf.mxu0 }
  0xd1   :  { %v155_v27 = vadd.f32 %v404_v26, %v356_v25 }
  0xd2   :  { %v149_v28 = vpop.f32.mrf.mxu0 }
  0xd3   :  { %v150_v29 = vadd.f32 %v356_v25, %v149_v28  ;;  %v189_v32 = vmax.f32 %v155_v27, 0.0 }
  0xd4   :  { %v407_v30 = vpop.f32.mrf.mxu0 }
  0xd5   :  { %v188_v31 = vmax.f32 %v150_v29, 0.0  ;;  %v165_v33 = vadd.f32 %v407_v30, %v356_v25 }
  0xd6   :  { %v159_v34 = vpop.f32.mrf.mxu0 }
  0xd7   :  { %446 = vmatprep.mubr.f32.mxu0 %v188_v31  ;;  %v160_v35 = vadd.f32 %v356_v25, %v159_v34  ;;  %v191_v38 = vmax.f32 %v165_v33, 0.0 }
  0xd8   :  { %v410_v36 = vpop.f32.mrf.mxu0  ;;  %447 = vmatmul.mubr.f32.vlgmr.msra.gmra.mxu0 %v189_v32 }
  0xd9   :  { %v190_v37 = vmax.f32 %v160_v35, 0.0  ;;  %v175_v39 = vadd.f32 %v410_v36, %v356_v25 }
  0xda   :  { %v169_v40 = vpop.f32.mrf.mxu0 }
  0xdb   :  { %v170_v41 = vadd.f32 %v356_v25, %v169_v40  ;;  %449 = vmatprep.mubr.f32.mxu1 %v190_v37  ;;  %v193_v44 = vmax.f32 %v175_v39, 0.0 }
  0xdc   :  { %v413_v42 = vpop.f32.mrf.mxu0  ;;  %450 = vmatmul.mubr.f32.vlgmr.msra.gmra.mxu1 %v191_v38 }
  0xdd   :  { %v192_v43 = vmax.f32 %v170_v41, 0.0  ;;  %v185_v45 = vadd.f32 %v413_v42, %v356_v25 }
  0xde   :  { %v179_v46 = vpop.f32.mrf.mxu0 }
  0xdf   :  { %v180_v47 = vadd.f32 %v356_v25, %v179_v46  ;;  %452 = vmatprep.mubr.f32.mxu1 %v192_v43  ;;  %v195_v49 = vmax.f32 %v185_v45, 0.0 }
  0xe0   :  { %453 = vmatmul.mubr.f32.gmra.mxu1 %v193_v44 }
  0xe1   :  { %v194_v48 = vmax.f32 %v180_v47, 0.0 }
  0xe3   :  { %455 = vmatprep.mubr.f32.mxu1 %v194_v48 }
  0xe4   :  { %456 = vmatmul.mubr.f32.gmra.mxu1 %v195_v49 }
 0x198   :  { %v448_v51 = vpop.f32.mrf.mxu0 }
 0x199   :  { %v291_v52 = vadd.f32 %v448_v51, %v366_v50 }
 0x19a   :  { %v285_v53 = vpop.f32.mrf.mxu0 }
 0x19b   :  { %493 = vtanh.f32 %v291_v52  ;;  %v286_v54 = vadd.f32 %v366_v50, %v285_v53 }
 0x19c   :  { %v451_v55 = vpop.f32.mrf.mxu1 }
 0x19d   :  { %495 = vtanh.f32 %v286_v54  ;;  %v301_v56 = vadd.f32 %v451_v55, %v366_v50 }
 0x19e   :  { %v295_v57 = vpop.f32.mrf.mxu1 }
 0x19f   :  { %497 = vtanh.f32 %v301_v56  ;;  %v296_v58 = vadd.f32 %v366_v50, %v295_v57 }
 0x1a0   :  { %v454_v59 = vpop.f32.mrf.mxu1 }
 0x1a1   :  { %499 = vtanh.f32 %v296_v58  ;;  %v311_v60 = vadd.f32 %v454_v59, %v366_v50 }
 0x1a2   :  { %v305_v61 = vpop.f32.mrf.mxu1 }
 0x1a3   :  { %501 = vtanh.f32 %v311_v60  ;;  %v306_v62 = vadd.f32 %v366_v50, %v305_v61 }
 0x1a4   :  { %v457_v63 = vpop.f32.mrf.mxu1 }
 0x1a5   :  { %503 = vtanh.f32 %v306_v62  ;;  %v321_v0 = vadd.f32 %v457_v63, %v366_v50 }
 0x1a6   :  { %v315_v2 = vpop.f32.mrf.mxu1 }
 0x1a7   :  { %505 = vtanh.f32 %v321_v0  ;;  %v316_v3 = vadd.f32 %v366_v50, %v315_v2 }
 0x1a8   :  { %v494_v4 = vpop.eup %493 }
 0x1a9   :  { %v335_v5 = vmul.f32 %v494_v4, %v333_v1  ;;  %507 = vtanh.f32 %v316_v3 }
 0x1aa   :  { %v496_v6 = vpop.eup %495 }
 0x1ab   :  { %344 = vst.msk [vmem:[%s654_s6 + $0x8] sm:$0xff] %vm342_vm2, %v335_v5  ;;  %v334_v7 = vmul.f32 %v496_v6, %v333_v1 }
 0x1ac   :  { %v498_v8 = vpop.eup %497 }
 0x1ad   :  { %343 = vst.msk [vmem:[%s654_s6] sm:$0xff] %vm342_vm2, %v334_v7  ;;  %v337_v9 = vmul.f32 %v498_v8, %v333_v1 }
 0x1ae   :  { %v500_v10 = vpop.eup %499 }
 0x1af   :  { %346 = vst.msk [vmem:[%s654_s6 + $0x18] sm:$0xff] %vm342_vm2, %v337_v9  ;;  %v336_v11 = vmul.f32 %v500_v10, %v333_v1 }
 0x1b0   :  { %v502_v12 = vpop.eup %501 }
 0x1b1   :  { %345 = vst.msk [vmem:[%s654_s6 + $0x10] sm:$0xff] %vm342_vm2, %v336_v11  ;;  %v339_v13 = vmul.f32 %v502_v12, %v333_v1 }
 0x1b2   :  { %v504_v14 = vpop.eup %503 }
 0x1b3   :  { %348 = vst.msk [vmem:[%s654_s6 + $0x28] sm:$0xff] %vm342_vm2, %v339_v13  ;;  %v338_v15 = vmul.f32 %v504_v14, %v333_v1 }
 0x1b4   :  { %v506_v16 = vpop.eup %505 }
 0x1b5   :  { %347 = vst.msk [vmem:[%s654_s6 + $0x20] sm:$0xff] %vm342_vm2, %v338_v15  ;;  %v341_v17 = vmul.f32 %v506_v16, %v333_v1 }
 0x1b6   :  { %v508_v18 = vpop.eup %507 }
 0x1b7   :  { %350 = vst.msk [vmem:[%s654_s6 + $0x38] sm:$0xff] %vm342_vm2, %v341_v17  ;;  %v340_v19 = vmul.f32 %v508_v18, %v333_v1 }
 0x1b9   :  { %349 = vst.msk [vmem:[%s654_s6 + $0x30] sm:$0xff] %vm342_vm2, %v340_v19 }
 0x1ba   :  { %355 = vsyncpa [#allocation4], 1 }

</bundles_post_ra>
